<compile_context>
chip_gen: v6e
topology: v6e:2x2x1
jax: 0.10.0
libtpu: 0.0.40
codegen_flags: <defaults>
</compile_context>

<pallas_src>
import math

import jax
import jax.numpy as jnp
from jax.experimental import pallas as pl
from jax.experimental.pallas import tpu as pltpu


LANE = 128
BN_EPS = 1e-5


def _round_up(v, m):
    return ((v + m - 1) // m) * m


def _buffered1_supported():
    """Detect pipeline_mode=pl.Buffered support once, at spec-construction time."""
    try:
        pl.BlockSpec((8, LANE), lambda i: (0, 0), pipeline_mode=pl.Buffered(buffer_count=1))
        return True
    except (TypeError, AttributeError, NotImplementedError):
        return False


_HAS_BUFFERED1 = _buffered1_supported()


# ---------------------------------------------------------------------------
# Kernel
# ---------------------------------------------------------------------------
def _make_mlp_kernel(num_layers, compute_dtype):
    """Fused (matmul + bias + ReLU)^{L-1} -> matmul + bias over one batch tile."""

    def kernel(*refs):
        x_ref = refs[0]
        out_ref = refs[-1]
        params = refs[1:-1]                       # (w0, b0, w1, b1, ..., w_{L-1}, b_{L-1})

        h = x_ref[...].astype(compute_dtype)      # f32 tile -> bf16 for the MXU (cheap VPU cast)
        for li in range(num_layers):
            w_ref = params[2 * li]
            b_ref = params[2 * li + 1]
            # MXU matmul: bf16 x bf16 -> f32 accumulate.
            acc = jnp.dot(h, w_ref[...], preferred_element_type=jnp.float32)
            acc = acc + b_ref[...]                # f32 bias (BN affine already folded in)
            if li < num_layers - 1:
                h = jnp.maximum(acc, 0.0).astype(compute_dtype)   # ReLU; dropout = identity (eval)
            else:
                # Last layer's out dim is un-padded -> direct, un-sliced store.
                out_ref[...] = acc.astype(out_ref.dtype)

    return kernel


# ---------------------------------------------------------------------------
# One-time parameter preparation (do NOT call per forward if params are static)
# ---------------------------------------------------------------------------
def prepare_mlp_params(params, c, rho=1.0, *, eps=BN_EPS, lane=LANE,
                       weight_dtype=jnp.bfloat16):
    """Transpose to (in, out), fold rho*c into bias0, fold eval-mode BN into the next layer,
    zero-pad HIDDEN output dims to lane multiples (last layer stays un-padded) and cast
    weights to `weight_dtype`.

    Note: folding the BN scale s = gamma/sqrt(var+eps) into bf16 weights keeps ~8 mantissa
    bits on s*W; pass weight_dtype=jnp.float32 if running stats make that too lossy.

    Returns layers = [(W_i (in,out), b_i (1,out) f32)].
    """
    ws, bs = params["w"], params["b"]
    gammas, betas = params["bn_gamma"], params["bn_beta"]
    means, varis = params["bn_mean"], params["bn_var"]
    num_layers = len(ws)

    # 1) fold (rho*c) and BN affines; weights in (in, out) layout, f32.
    folded = []
    for li in range(num_layers):
        w_t = jnp.transpose(ws[li]).astype(jnp.float32)    # (in, out)
        b = bs[li].astype(jnp.float32)                      # (out,)
        if li == 0:
            if rho != 0.0:
                d = c.shape[0]
                assert w_t.shape[0] == 2 * d, (
                    "first Linear expects in_channels == 2*D when rho != 0")
                w_top, w_bot = w_t[:d], w_t[d:]
                b = b + (rho * c.astype(jnp.float32)) @ w_bot
                w_t = w_top
        else:
            # Fold previous layer's eval-mode BatchNorm (y = h*s + t) into this Linear.
            s = gammas[li - 1] / jnp.sqrt(varis[li - 1] + eps)
            t = betas[li - 1] - means[li - 1] * s
            b = b + t @ w_t
            w_t = s[:, None] * w_t
        folded.append((w_t, b))

    # 2) pad hidden output dims (and matching input rows of the next layer) to lane multiples;
    #    the LAST layer's output dim stays exact so the kernel writes an un-padded output.
    layers = []
    prev_out_pad = None
    for li, (w, b) in enumerate(folded):
        fin, fout = w.shape
        last = (li == num_layers - 1)
        fout_pad = fout if last else _round_up(fout, lane)
        fin_pad = fin if li == 0 else prev_out_pad
        w_p = jnp.zeros((fin_pad, fout_pad), jnp.float32).at[:fin, :fout].set(w)
        b_p = jnp.zeros((fout_pad,), jnp.float32).at[:fout].set(b)
        layers.append((w_p.astype(weight_dtype), b_p[None, :]))
        prev_out_pad = fout_pad

    return layers


# ---------------------------------------------------------------------------
# Pallas call wrapper
# ---------------------------------------------------------------------------
def mlp_pallas_prepared(x, layers, *, block_rows=512, compute_dtype=jnp.bfloat16):
    """Run the fused MLP on prepared layers. x: (N, D) float32 -> (N, out_channels) float32."""
    N, D = x.shape
    assert layers[0][0].shape[0] == D, (
        f"first layer expects {layers[0][0].shape[0]} input features, got {D}")

    num_layers = len(layers)
    out_dim = layers[-1][0].shape[1]

    # Batch tiling: rows multiple of 8; aim for >= ~8 grid steps (software-pipeline ramp and
    # both v7x TensorCores busy on the 'parallel' axis), capped at block_rows for v5e/v6e.
    bs = min(block_rows, max(8, _round_up(-(-N // 8), 8)))
    bs = max(8, (bs // 8) * 8)
    grid = (pl.cdiv(N, bs),)
    # If bs does not divide N, the last block's out-of-bounds rows compute garbage but are
    # never written back (rows are independent; there is no cross-batch reduction).

    # VMEM budget from actual footprint, clamped to ~75% of the chip's per-core VMEM.
    weight_bytes = sum(int(w.size) * w.dtype.itemsize + int(b.size) * b.dtype.itemsize
                       for w, b in layers)
    max_feat = max(max(w.shape) for w, _ in layers)
    act_bytes = (bs * D * 4 * 2            # f32 input tile, double buffered
                 + bs * out_dim * 4 * 2    # f32 output tile, double buffered
                 + bs * max_feat * 4 * 4)  # f32 intermediates / headroom
    try:
        vmem_cap = int(pltpu.get_tpu_info().vmem_capacity_bytes)
    except Exception:
        vmem_cap = 64 * 2 ** 20            # conservative default (v7x per-core VMEM)
    budget = (vmem_cap * 3) // 4
    need = 2 * weight_bytes + act_bytes    # x2: worst case weights end up double-buffered
    if need > budget:
        # TODO(synk): stream layers / tile the fout dimension (pltpu.emit_pipeline) for MLPs
        # whose resident weights do not fit VMEM (relevant on v7x's 64 MiB per core).
        raise ValueError(
            f"resident weights + activations (~{need >> 20} MiB) exceed ~75% of VMEM "
            f"({budget >> 20} MiB); reduce hidden width / block_rows or add layer streaming.")
    vmem_limit = int(min(max(need, 16 * 2 ** 20), budget))

    def _const_spec(shape):
        n = len(shape)
        index_map = lambda i, _n=n: (0,) * _n
        if _HAS_BUFFERED1:
            # Constant-index weight/bias blocks gain nothing from double-buffering.
            return pl.BlockSpec(shape, index_map, pipeline_mode=pl.Buffered(buffer_count=1))
        return pl.BlockSpec(shape, index_map)

    in_specs = [pl.BlockSpec((bs, D), lambda i: (i, 0))]
    operands = [x]
    for w, b in layers:
        in_specs.append(_const_spec(w.shape))
        in_specs.append(_const_spec(b.shape))
        operands.append(w)
        operands.append(b)

    return pl.pallas_call(
        _make_mlp_kernel(num_layers, compute_dtype),
        out_shape=jax.ShapeDtypeStruct((N, out_dim), jnp.float32),
        grid=grid,
        in_specs=in_specs,
        out_specs=pl.BlockSpec((bs, out_dim), lambda i: (i, 0)),
        compiler_params=pltpu.CompilerParams(
            dimension_semantics=("parallel",),
            vmem_limit_bytes=vmem_limit),
    )(*operands)


def mlp_pallas(x, c, params, *, rho=1.0, block_rows=512):
    """Convenience wrapper: prepare params (ideally done once) then run the kernel."""
    layers = prepare_mlp_params(params, c, rho=rho)
    return mlp_pallas_prepared(x, layers, block_rows=block_rows)


# ---------------------------------------------------------------------------
# Pure-JAX reference (eval-mode PyTorch semantics, f32 throughout)
# ---------------------------------------------------------------------------
def mlp_reference(x, c, params, *, rho=1.0):
    if rho != 0.0:
        cexp = jnp.broadcast_to((rho * c)[None, :], x.shape)
        x = jnp.concatenate([x, cexp], axis=-1)
    num_hidden = len(params["w"]) - 1
    h = x
    for li in range(num_hidden):
        h = h @ params["w"][li].T + params["b"][li]
        h = jnp.maximum(h, 0.0)
        h = (h - params["bn_mean"][li]) / jnp.sqrt(params["bn_var"][li] + BN_EPS)
        h = h * params["bn_gamma"][li] + params["bn_beta"][li]
    return h @ params["w"][-1].T + params["b"][-1]


def init_mlp_params(key, in_channels, hidden_channels, out_channels, num_layers):
    """Deterministic init mimicking nn.Linear / nn.BatchNorm1d defaults."""
    ws, bs = [], []
    gammas, betas, means, varis = [], [], [], []

    if num_layers == 1:
        dims = [(in_channels, out_channels)]
    else:
        dims = [(in_channels, hidden_channels)]
        dims += [(hidden_channels, hidden_channels)] * (num_layers - 2)
        dims += [(hidden_channels, out_channels)]

    for li, (fan_in, fan_out) in enumerate(dims):
        key, kw, kb = jax.random.split(key, 3)
        bound = 1.0 / math.sqrt(fan_in)
        ws.append(jax.random.uniform(kw, (fan_out, fan_in), jnp.float32, -bound, bound))
        bs.append(jax.random.uniform(kb, (fan_out,), jnp.float32, -bound, bound))
        if li < len(dims) - 1:
            gammas.append(jnp.ones((fan_out,), jnp.float32))
            betas.append(jnp.zeros((fan_out,), jnp.float32))
            means.append(jnp.zeros((fan_out,), jnp.float32))
            varis.append(jnp.ones((fan_out,), jnp.float32))

    return {"w": ws, "b": bs, "bn_gamma": gammas, "bn_beta": betas,
            "bn_mean": means, "bn_var": varis}


if __name__ == "__main__":
    # x is (N, D), c is (D,); with rho != 0 the first Linear sees 2*D features.
    N, D = 512, 16
    in_channels = 2 * D
    hidden_channels = 32
    out_channels = 16
    num_layers = 3
    rho = 1.0

    key = jax.random.PRNGKey(0)
    key, kx, kc, kp = jax.random.split(key, 4)
    x = jax.random.normal(kx, (N, D), jnp.float32)
    c = jax.random.normal(kc, (D,), jnp.float32)
    params = init_mlp_params(kp, in_channels, hidden_channels, out_channels, num_layers)

    # Prepare params once (transpose / BN + rho*c fold / lane padding / bf16 cast)...
    layers = prepare_mlp_params(params, c, rho=rho)
    # ...then run the fused kernel (64-row batch tiles -> 8 grid steps here).
    out = mlp_pallas_prepared(x, layers)
    out = jax.block_until_ready(out)

    ref = mlp_reference(x, c, params, rho=rho)
    assert out.shape == (N, out_channels), out.shape
    # Tolerance loosened vs the f32 reference because matmuls use bf16 MXU operands.
    assert jnp.allclose(out, ref, atol=3e-2, rtol=3e-2), "mismatch vs reference"

    print("KERNEL_OK")
</pallas_src>

<mosaic_0001>
module attributes {stable_mosaic.version = 11 : i64} {
  func.func @kernel(%arg0: i32, %arg1: memref<64x16xf32, #tpu.memory_space<vmem>>, %arg2: memref<16x128xbf16, #tpu.memory_space<vmem>>, %arg3: memref<1x128xf32, #tpu.memory_space<vmem>>, %arg4: memref<128x128xbf16, #tpu.memory_space<vmem>>, %arg5: memref<1x128xf32, #tpu.memory_space<vmem>>, %arg6: memref<128x16xbf16, #tpu.memory_space<vmem>>, %arg7: memref<1x16xf32, #tpu.memory_space<vmem>>, %arg8: memref<64x16xf32, #tpu.memory_space<vmem>>) attributes {dimension_semantics = [#tpu.dimension_semantics<parallel>], iteration_bounds = array<i64: 8>, scalar_prefetch = 0 : i64, scratch_operands = 0 : i64, tpu.core_type = #tpu.core_type<tc>, window_params = [{transform_indices = @transform_0, window_bounds = array<i64: 64, 16>}, {pipeline_mode = #tpu.pipeline_mode<synchronous>, transform_indices = @transform_1, window_bounds = array<i64: 16, 128>}, {pipeline_mode = #tpu.pipeline_mode<synchronous>, transform_indices = @transform_2, window_bounds = array<i64: 1, 128>}, {pipeline_mode = #tpu.pipeline_mode<synchronous>, transform_indices = @transform_3, window_bounds = array<i64: 128, 128>}, {pipeline_mode = #tpu.pipeline_mode<synchronous>, transform_indices = @transform_4, window_bounds = array<i64: 1, 128>}, {pipeline_mode = #tpu.pipeline_mode<synchronous>, transform_indices = @transform_5, window_bounds = array<i64: 128, 16>}, {pipeline_mode = #tpu.pipeline_mode<synchronous>, transform_indices = @transform_6, window_bounds = array<i64: 1, 16>}, {transform_indices = @transform_7, window_bounds = array<i64: 64, 16>}]} {
    %c0 = arith.constant 0 : index
    %c0_0 = arith.constant 0 : index
    %0 = vector.load %arg1[%c0, %c0_0] : memref<64x16xf32, #tpu.memory_space<vmem>>, vector<64x16xf32>
    %1 = arith.truncf %0 : vector<64x16xf32> to vector<64x16xbf16>
    %c0_1 = arith.constant 0 : index
    %c0_2 = arith.constant 0 : index
    %2 = vector.load %arg2[%c0_1, %c0_2] : memref<16x128xbf16, #tpu.memory_space<vmem>>, vector<16x128xbf16>
    %cst = arith.constant dense<0.000000e+00> : vector<64x128xf32>
    %3 = tpu.matmul %1, %2, %cst {dimension_numbers = #tpu.dot_dimension_numbers<[1], [0], [0], [1], [0, 0, 1, 1], [], []>} : vector<64x16xbf16>, vector<16x128xbf16>, vector<64x128xf32> -> vector<64x128xf32>
    %c0_3 = arith.constant 0 : index
    %c0_4 = arith.constant 0 : index
    %4 = vector.load %arg3[%c0_3, %c0_4] : memref<1x128xf32, #tpu.memory_space<vmem>>, vector<1x128xf32>
    %5 = vector.broadcast %4 : vector<1x128xf32> to vector<64x128xf32>
    %6 = arith.addf %3, %5 : vector<64x128xf32>
    %cst_5 = arith.constant 0.000000e+00 : f32
    %7 = vector.broadcast %cst_5 : f32 to vector<64x128xf32>
    %8 = arith.maximumf %6, %7 : vector<64x128xf32>
    %9 = arith.truncf %8 : vector<64x128xf32> to vector<64x128xbf16>
    %c0_6 = arith.constant 0 : index
    %c0_7 = arith.constant 0 : index
    %10 = vector.load %arg4[%c0_6, %c0_7] : memref<128x128xbf16, #tpu.memory_space<vmem>>, vector<128x128xbf16>
    %cst_8 = arith.constant dense<0.000000e+00> : vector<64x128xf32>
    %11 = tpu.matmul %9, %10, %cst_8 {dimension_numbers = #tpu.dot_dimension_numbers<[1], [0], [0], [1], [0, 0, 1, 1], [], []>} : vector<64x128xbf16>, vector<128x128xbf16>, vector<64x128xf32> -> vector<64x128xf32>
    %c0_9 = arith.constant 0 : index
    %c0_10 = arith.constant 0 : index
    %12 = vector.load %arg5[%c0_9, %c0_10] : memref<1x128xf32, #tpu.memory_space<vmem>>, vector<1x128xf32>
    %13 = vector.broadcast %12 : vector<1x128xf32> to vector<64x128xf32>
    %14 = arith.addf %11, %13 : vector<64x128xf32>
    %cst_11 = arith.constant 0.000000e+00 : f32
    %15 = vector.broadcast %cst_11 : f32 to vector<64x128xf32>
    %16 = arith.maximumf %14, %15 : vector<64x128xf32>
    %17 = arith.truncf %16 : vector<64x128xf32> to vector<64x128xbf16>
    %c0_12 = arith.constant 0 : index
    %c0_13 = arith.constant 0 : index
    %18 = vector.load %arg6[%c0_12, %c0_13] : memref<128x16xbf16, #tpu.memory_space<vmem>>, vector<128x16xbf16>
    %cst_14 = arith.constant dense<0.000000e+00> : vector<64x16xf32>
    %19 = tpu.matmul %17, %18, %cst_14 {dimension_numbers = #tpu.dot_dimension_numbers<[1], [0], [0], [1], [0, 0, 1, 1], [], []>} : vector<64x128xbf16>, vector<128x16xbf16>, vector<64x16xf32> -> vector<64x16xf32>
    %c0_15 = arith.constant 0 : index
    %c0_16 = arith.constant 0 : index
    %20 = vector.load %arg7[%c0_15, %c0_16] : memref<1x16xf32, #tpu.memory_space<vmem>>, vector<1x16xf32>
    %21 = vector.broadcast %20 : vector<1x16xf32> to vector<64x16xf32>
    %22 = arith.addf %19, %21 : vector<64x16xf32>
    %c0_17 = arith.constant 0 : index
    %c0_18 = arith.constant 0 : index
    %23 = vector.load %arg8[%c0_17, %c0_18] : memref<64x16xf32, #tpu.memory_space<vmem>>, vector<64x16xf32>
    tpu.vector_store %arg8[%c0_17, %c0_18], %22 {strides = array<i32>} : memref<64x16xf32, #tpu.memory_space<vmem>>, vector<64x16xf32>,
    return
  }
  func.func @transform_0(%arg0: i32) -> (i32, i32) {
    %c0_i32 = arith.constant 0 : i32
    %c0_i32_0 = arith.constant 0 : i32
    return %arg0, %c0_i32 : i32, i32
  }
  func.func @transform_1(%arg0: i32) -> (i32, i32) {
    %c0_i32 = arith.constant 0 : i32
    %c0_i32_0 = arith.constant 0 : i32
    %c0_i32_1 = arith.constant 0 : i32
    return %c0_i32, %c0_i32_0 : i32, i32
  }
  func.func @transform_2(%arg0: i32) -> (i32, i32) {
    %c0_i32 = arith.constant 0 : i32
    %c0_i32_0 = arith.constant 0 : i32
    %c0_i32_1 = arith.constant 0 : i32
    return %c0_i32, %c0_i32_0 : i32, i32
  }
  func.func @transform_3(%arg0: i32) -> (i32, i32) {
    %c0_i32 = arith.constant 0 : i32
    %c0_i32_0 = arith.constant 0 : i32
    %c0_i32_1 = arith.constant 0 : i32
    return %c0_i32, %c0_i32_0 : i32, i32
  }
  func.func @transform_4(%arg0: i32) -> (i32, i32) {
    %c0_i32 = arith.constant 0 : i32
    %c0_i32_0 = arith.constant 0 : i32
    %c0_i32_1 = arith.constant 0 : i32
    return %c0_i32, %c0_i32_0 : i32, i32
  }
  func.func @transform_5(%arg0: i32) -> (i32, i32) {
    %c0_i32 = arith.constant 0 : i32
    %c0_i32_0 = arith.constant 0 : i32
    %c0_i32_1 = arith.constant 0 : i32
    return %c0_i32, %c0_i32_0 : i32, i32
  }
  func.func @transform_6(%arg0: i32) -> (i32, i32) {
    %c0_i32 = arith.constant 0 : i32
    %c0_i32_0 = arith.constant 0 : i32
    %c0_i32_1 = arith.constant 0 : i32
    return %c0_i32, %c0_i32_0 : i32, i32
  }
  func.func @transform_7(%arg0: i32) -> (i32, i32) {
    %c0_i32 = arith.constant 0 : i32
    %c0_i32_0 = arith.constant 0 : i32
    return %arg0, %c0_i32 : i32, i32
  }
}

</mosaic_0001>

<bundles_post_ra>
// kernel: tpu_custom_call.1
= control target key start
LH: loop header
LB: loop body
LE: loop exit
PB: predicated region body
PF: predicated region fallthrough
CT: control target
= control target key end

     0   :  { %s943_s24 = smov 0   ;;  %s1039_s0 = inlined_call_operand.vmem [shape: f32[512,16], index: 0, kind: input, shape index: {}]   ;;  %s1040_s1 = inlined_call_operand.vmem [shape: bf16[16,128], index: 1, kind: input, shape index: {}]   ;;  %s1041_s2 = inlined_call_operand.vmem [shape: f32[1,128], index: 2, kind: input, shape index: {}]   ;;  %s1042_s3 = inlined_call_operand.vmem [shape: bf16[128,128], index: 3, kind: input, shape index: {}]   ;;  %s1043_s4 = inlined_call_operand.vmem [shape: f32[1,128], index: 4, kind: input, shape index: {}]   ;;  %s1044_s5 = inlined_call_operand.vmem [shape: bf16[128,16], index: 5, kind: input, shape index: {}]   ;;  %s1045_s6 = inlined_call_operand.vmem [shape: f32[1,16], index: 6, kind: input, shape index: {}]   ;;  %s1046_s7 = inlined_call_operand.vmem [shape: f32[512,16], index: 7, kind: output, shape index: {}]  }
   0x1 LB: > { %s748_s25 = sadd.s32 4294967295, %s901_s24   ;;  %p752_p0 = scmp.ge.s32.totalorder %s901_s24, 1  ;;  %s901_s24 = sphi %s943_s24, %s17_s24  }
   0x2   : > { %p238_p1 = scmp.lt.s32.totalorder %s901_s24, 9 }
   0x4   : > { %p239_p2 = pnand %p752_p0, %p238_p1 }
   0x5   : > { %s753_s28 = sshll.u32 (!%p239_p2), %s748_s25, 3 }
   0x6   : > { %242 = sbr.rel (%p239_p2) target bundleno = 640 (0x280), region = 48  ;;  %p271_p3 = scmp.lt.s32.totalorder (!%p239_p2), %s753_s28, 63 }
   0xb   : > { %v878_v0 = vld [vmem:[%s1040_s1] sm:$0xff]   ;;  %v879_v1 = vld [vmem:[%s1042_s3 + $0x38] sm:$0xff]   ;;  %s1048_s28 = smov (!%p271_p3, %s753_s28), 63  ;;  %v880_v2 = vld [vmem:[%s1042_s3 + $0x30] sm:$0xff]   ;;  %vm310_vm0 = vcmask 130048  }
   0xc   : > { %812 = vmatprep.subr.bf16.mxu0 %v878_v0  ;;  %822 = vmatprep.subr.bf16.mxu1 %v879_v1  ;;  %s754_s10 = sshll.u32 %s1048_s28, 3  ;;  %v881_v3 = vld [vmem:[%s1042_s3 + $0x28] sm:$0xff]   ;;  %v882_v13 = vld [vmem:[%s1042_s3 + $0x20] sm:$0xff]   ;;  %v883_v16 = vld [vmem:[%s1042_s3 + $0x18] sm:$0xff]  }
   0xd   : > { %813 = vmatpush3.bf16.msra.mxu0 %v878_v0  ;;  %823 = vmatpush3.bf16.msra.mxu1 %v879_v1  ;;  %s274_s13 = scalar_lea.vmem %s1039_s0, %s754_s10  ;;  %v884_v18 = vld [vmem:[%s1042_s3 + $0x10] sm:$0xff]   ;;  %v885_v19 = vld [vmem:[%s1042_s3 + $0x8] sm:$0xff]   ;;  %v886_v20 = vld [vmem:[%s1042_s3] sm:$0xff]   ;;  %s280_s9 = scalar_lea.vmem %s1046_s7, %s754_s10 }
   0xe   : > { %824 = vmatprep.subr.bf16.mxu1 %v880_v2  ;;  %v283_v4 = vld [vmem:[%s274_s13] sm:$0xff]  ;;  %v284_v5 = vld [vmem:[%s274_s13 + $0x8] sm:$0xff]  ;;  %v285_v6 = vld [vmem:[%s274_s13 + $0x10] sm:$0xff] }
   0xf   : > { %v291_v7 = vpack.c.bf16 %v284_v5, %v283_v4  ;;  %v286_v8 = vld [vmem:[%s274_s13 + $0x18] sm:$0xff]  ;;  %v287_v9 = vld [vmem:[%s274_s13 + $0x20] sm:$0xff]  ;;  %v288_v10 = vld [vmem:[%s274_s13 + $0x28] sm:$0xff] }
  0x10   : > { %v292_v11 = vpack.c.bf16 %v286_v8, %v285_v6  ;;  %v293_v12 = vpack.c.bf16 %v288_v10, %v287_v9  ;;  %v289_v14 = vld [vmem:[%s274_s13 + $0x30] sm:$0xff]  ;;  %v290_v15 = vld [vmem:[%s274_s13 + $0x38] sm:$0xff]  ;;  %v889_v23 = vld [vmem:[%s1044_s5 + $0x28] sm:$0xff]  }
  0x11   : > { %825 = vmatpush3.bf16.msra.mxu1 %v880_v2  ;;  %814 = vmatprep.mubr.msk.bf16.mxu0 %vm310_vm0, %v291_v7  ;;  %v294_v17 = vpack.c.bf16 %v290_v15, %v289_v14  ;;  %v887_v21 = vld [vmem:[%s1044_s5 + $0x38] sm:$0xff]   ;;  %v888_v22 = vld [vmem:[%s1044_s5 + $0x30] sm:$0xff]   ;;  %v890_v24 = vld [vmem:[%s1044_s5 + $0x20] sm:$0xff]  }
  0x12   : > { %826 = vmatprep.subr.bf16.mxu1 %v881_v3  ;;  %815 = vmatmul.mubr.msk.bf16.vlgmr.msra.gmra.mxu0 %vm310_vm0, %v292_v11  ;;  %v891_v25 = vld [vmem:[%s1044_s5 + $0x18] sm:$0xff]   ;;  %v757_v28 = vld [vmem:[%s1041_s2] ss:$0 sm:$0xff]  ;;  %v892_v55 = vld [vmem:[%s1044_s5 + $0x10] sm:$0xff]  }
  0x13   : > { %818 = vmatprep.mubr.msk.bf16.mxu0 %vm310_vm0, %v293_v12  ;;  %846 = vmatprep.subr.bf16.mxu0 %v887_v21  ;;  %v893_v56 = vld [vmem:[%s1044_s5 + $0x8] sm:$0xff]   ;;  %v894_v57 = vld [vmem:[%s1044_s5] sm:$0xff]  }
  0x14   : > { %847 = vmatpush3.bf16.msra.mxu0 %v887_v21  ;;  %v763_v60 = vld [vmem:[%s1043_s4] ss:$0 sm:$0xff] }
  0x15   : > { %827 = vmatpush3.bf16.msra.mxu1 %v881_v3  ;;  %848 = vmatprep.subr.bf16.mxu0 %v888_v22 }
  0x16   : > { %828 = vmatprep.subr.bf16.mxu1 %v882_v13 }
  0x18   : > { %849 = vmatpush3.bf16.msra.mxu0 %v888_v22 }
  0x19   : > { %829 = vmatpush3.bf16.msra.mxu1 %v882_v13  ;;  %850 = vmatprep.subr.bf16.mxu0 %v889_v23 }
  0x1a   : > { %830 = vmatprep.subr.bf16.mxu1 %v883_v16  ;;  %819 = vmatmul.mubr.msk.bf16.gmra.mxu0 %vm310_vm0, %v294_v17 }
  0x1c   : > { %851 = vmatpush3.bf16.msra.mxu0 %v889_v23  ;;  %v772_v23 = vld [vmem:[%s1045_s6] ss:$0 sm:$0xff] }
  0x1d   : > { %831 = vmatpush3.bf16.msra.mxu1 %v883_v16  ;;  %852 = vmatprep.subr.bf16.mxu0 %v890_v24 }
  0x1e   : > { %832 = vmatprep.subr.bf16.mxu1 %v884_v18 }
  0x20   : > { %853 = vmatpush3.bf16.msra.mxu0 %v890_v24 }
  0x21   : > { %833 = vmatpush3.bf16.msra.mxu1 %v884_v18  ;;  %854 = vmatprep.subr.bf16.mxu0 %v891_v25 }
  0x22   : > { %834 = vmatprep.subr.bf16.mxu1 %v885_v19 }
  0x24   : > { %855 = vmatpush3.bf16.msra.mxu0 %v891_v25 }
  0x25   : > { %835 = vmatpush3.bf16.msra.mxu1 %v885_v19  ;;  %856 = vmatprep.subr.bf16.mxu0 %v892_v55 }
  0x26   : > { %836 = vmatprep.subr.bf16.mxu1 %v886_v20 }
  0x28   : > { %857 = vmatpush3.bf16.msra.mxu0 %v892_v55 }
  0x29   : > { %837 = vmatpush3.bf16.msra.mxu1 %v886_v20  ;;  %858 = vmatprep.subr.bf16.mxu0 %v893_v56 }
  0x2c   : > { %859 = vmatpush3.bf16.msra.mxu0 %v893_v56 }
  0x2d   : > { %860 = vmatprep.subr.bf16.mxu0 %v894_v57 }
  0x30   : > { %861 = vmatpush3.bf16.msra.mxu0 %v894_v57 }
  0xd2   : > { %v816_v26 = vpop.f32.mrf.mxu0 }
  0xd3   : > { %v366_v32 = vadd.f32 %v816_v26, %v757_v28 }
  0xd4   : > { %v357_v27 = vpop.f32.mrf.mxu0 }
  0xd5   : > { %v358_v30 = vadd.f32 %v757_v28, %v357_v27  ;;  %v390_v39 = vmax.f32 %v366_v32, 0.0 }
  0xd6   : > { %v817_v29 = vpop.f32.mrf.mxu0 }
  0xd7   : > { %v369_v31 = vadd.f32 %v817_v29, %v757_v28  ;;  %v388_v37 = vmax.f32 %v358_v30, 0.0 }
  0xd8   : > { %v360_v33 = vpop.f32.mrf.mxu0 }
  0xd9   : > { %v361_v34 = vadd.f32 %v757_v28, %v360_v33  ;;  %v391_v35 = vmax.f32 %v369_v31, 0.0 }
  0xda   : > { %v820_v36 = vpop.f32.mrf.mxu0 }
  0xdb   : > { %v389_v38 = vmax.f32 %v361_v34, 0.0  ;;  %v397_v42 = vpack.c.bf16 %v391_v35, %v390_v39  ;;  %v382_v46 = vadd.f32 %v820_v36, %v757_v28 }
  0xdc   : > { %v373_v40 = vpop.f32.mrf.mxu0 }
  0xdd   : > { %v396_v41 = vpack.c.bf16 %v389_v38, %v388_v37  ;;  %v374_v44 = vadd.f32 %v757_v28, %v373_v40  ;;  %v394_v52 = vmax.f32 %v382_v46, 0.0 }
  0xde   : > { %v821_v43 = vpop.f32.mrf.mxu0 }
  0xdf   : > { %v385_v45 = vadd.f32 %v821_v43, %v757_v28  ;;  %838 = vmatprep.mubr.bf16.mxu1 %v396_v41  ;;  %v392_v50 = vmax.f32 %v374_v44, 0.0 }
  0xe0   : > { %v376_v47 = vpop.f32.mrf.mxu0  ;;  %839 = vmatmul.mubr.bf16.vlgmr.msra.gmra.mxu1 %v397_v42 }
  0xe1   : > { %v377_v48 = vadd.f32 %v757_v28, %v376_v47  ;;  %v395_v49 = vmax.f32 %v385_v45, 0.0 }
  0xe3   : > { %v393_v51 = vmax.f32 %v377_v48, 0.0  ;;  %v399_v54 = vpack.c.bf16 %v395_v49, %v394_v52 }
  0xe5   : > { %v398_v53 = vpack.c.bf16 %v393_v51, %v392_v50 }
  0xe7   : > { %842 = vmatprep.mubr.bf16.mxu1 %v398_v53 }
  0xe8   : > { %843 = vmatmul.mubr.bf16.gmra.mxu1 %v399_v54 }
 0x1a0   : > { %v840_v58 = vpop.f32.mrf.mxu1 }
 0x1a1   : > { %v514_v0 = vadd.f32 %v840_v58, %v763_v60 }
 0x1a2   : > { %v505_v59 = vpop.f32.mrf.mxu1 }
 0x1a3   : > { %v506_v62 = vadd.f32 %v763_v60, %v505_v59  ;;  %v538_v7 = vmax.f32 %v514_v0, 0.0 }
 0x1a4   : > { %v841_v61 = vpop.f32.mrf.mxu1 }
 0x1a5   : > { %v517_v63 = vadd.f32 %v841_v61, %v763_v60  ;;  %v536_v5 = vmax.f32 %v506_v62, 0.0 }
 0x1a6   : > { %v508_v1 = vpop.f32.mrf.mxu1 }
 0x1a7   : > { %v509_v2 = vadd.f32 %v763_v60, %v508_v1  ;;  %v539_v3 = vmax.f32 %v517_v63, 0.0 }
 0x1a8   : > { %v844_v4 = vpop.f32.mrf.mxu1 }
 0x1a9   : > { %v537_v6 = vmax.f32 %v509_v2, 0.0  ;;  %v545_v10 = vpack.c.bf16 %v539_v3, %v538_v7  ;;  %v530_v14 = vadd.f32 %v844_v4, %v763_v60 }
 0x1aa   : > { %v521_v8 = vpop.f32.mrf.mxu1 }
 0x1ab   : > { %v544_v9 = vpack.c.bf16 %v537_v6, %v536_v5  ;;  %v522_v12 = vadd.f32 %v763_v60, %v521_v8  ;;  %v542_v20 = vmax.f32 %v530_v14, 0.0 }
 0x1ac   : > { %v845_v11 = vpop.f32.mrf.mxu1 }
 0x1ad   : > { %v533_v13 = vadd.f32 %v845_v11, %v763_v60  ;;  %862 = vmatprep.mubr.bf16.mxu0 %v544_v9  ;;  %v540_v18 = vmax.f32 %v522_v12, 0.0 }
 0x1ae   : > { %v524_v15 = vpop.f32.mrf.mxu1  ;;  %863 = vmatmul.mubr.bf16.vlgmr.msra.gmra.mxu0 %v545_v10 }
 0x1af   : > { %v525_v16 = vadd.f32 %v763_v60, %v524_v15  ;;  %v543_v17 = vmax.f32 %v533_v13, 0.0 }
 0x1b1   : > { %v541_v19 = vmax.f32 %v525_v16, 0.0  ;;  %v547_v22 = vpack.c.bf16 %v543_v17, %v542_v20 }
 0x1b3   : > { %v546_v21 = vpack.c.bf16 %v541_v19, %v540_v18 }
 0x1b5   : > { %866 = vmatprep.mubr.bf16.mxu0 %v546_v21 }
 0x1b6   : > { %867 = vmatmul.mubr.bf16.gmra.mxu0 %v547_v22 }
 0x26e   : > { %v864_v24 = vpop.f32.mrf.mxu0 }
 0x26f   : > { %v662_v25 = vadd.f32 %v864_v24, %v772_v23 }
 0x270   : > { %v653_v26 = vpop.f32.mrf.mxu0 }
 0x271   : > { %686 = vst.msk [vmem:[%s280_s9 + $0x10] sm:$0xff] %vm310_vm0, %v662_v25  ;;  %v654_v27 = vadd.f32 %v772_v23, %v653_v26 }
 0x272   : > { %v865_v28 = vpop.f32.mrf.mxu0 }
 0x273   : > { %684 = vst.msk [vmem:[%s280_s9] sm:$0xff] %vm310_vm0, %v654_v27  ;;  %v665_v29 = vadd.f32 %v865_v28, %v772_v23 }
 0x274   : > { %v656_v30 = vpop.f32.mrf.mxu0 }
 0x275   : > { %687 = vst.msk [vmem:[%s280_s9 + $0x18] sm:$0xff] %vm310_vm0, %v665_v29  ;;  %v657_v31 = vadd.f32 %v772_v23, %v656_v30 }
 0x276   : > { %v868_v32 = vpop.f32.mrf.mxu0 }
 0x277   : > { %685 = vst.msk [vmem:[%s280_s9 + $0x8] sm:$0xff] %vm310_vm0, %v657_v31  ;;  %v678_v33 = vadd.f32 %v868_v32, %v772_v23 }
 0x278   : > { %v669_v34 = vpop.f32.mrf.mxu0 }
 0x279   : > { %690 = vst.msk [vmem:[%s280_s9 + $0x30] sm:$0xff] %vm310_vm0, %v678_v33  ;;  %v670_v35 = vadd.f32 %v772_v23, %v669_v34 }
 0x27a   : > { %v869_v36 = vpop.f32.mrf.mxu0 }
 0x27b   : > { %688 = vst.msk [vmem:[%s280_s9 + $0x20] sm:$0xff] %vm310_vm0, %v670_v35  ;;  %v681_v37 = vadd.f32 %v869_v36, %v772_v23 }
 0x27c   : > { %v672_v38 = vpop.f32.mrf.mxu0 }
 0x27d   : > { %691 = vst.msk [vmem:[%s280_s9 + $0x38] sm:$0xff] %vm310_vm0, %v681_v37  ;;  %v673_v39 = vadd.f32 %v772_v23, %v672_v38 }
 0x27f   : > { %689 = vst.msk [vmem:[%s280_s9 + $0x28] sm:$0xff] %vm310_vm0, %v673_v39 }
 0x280 PF: > { %s17_s24 = sadd.s32 1, %s901_s24  }
 0x281   : > { %p14_p4 = scmp.ge.s32.totalorder %s17_s24, 10  }
 0x283   :  { %16 = sbr.rel (!%p14_p4) target bundleno = 1 (0x1), region = 78 }

</bundles_post_ra>
